<compile_context>
chip_gen: v6e
topology: v6e:2x2x1
jax: 0.10.0
libtpu: 0.0.40
codegen_flags: <defaults>
</compile_context>

<pallas_src>
import jax
import jax.numpy as jnp
from jax.experimental import pallas as pl
from jax.experimental.pallas import tpu as pltpu

_LANE = 128       # vreg lane width
_SUBLANE = 8      # f32 sublane count
_MAX_TILE_B = 8192


def _round_up(v, m):
    return (v + m - 1) // m * m


def qnetwork_kernel(x_ref, w1_ref, b1_ref, w2_ref, b2_ref, w3_ref, b3_ref, out_ref):
    """Fused 3-layer MLP. Activations never leave VMEM/vregs; only x and q touch HBM.

    Biases are kept f32 so all bias/ReLU math is f32 even when the matmul
    operands are bf16 (MXU accumulates in f32 regardless).
    """
    x = x_ref[...]
    # Layer 1: Linear + ReLU.
    h1 = jnp.dot(x, w1_ref[...], preferred_element_type=jnp.float32)
    h1 = jnp.maximum(h1 + b1_ref[...], 0.0)
    # Layer 2: Linear + ReLU.
    h2 = jnp.dot(h1.astype(w2_ref.dtype), w2_ref[...], preferred_element_type=jnp.float32)
    h2 = jnp.maximum(h2 + b2_ref[...], 0.0)
    # Layer 3: Linear (output stays at the true action dim; a few masked store
    # lanes per row are far cheaper than a 128-wide padded HBM write).
    q = jnp.dot(h2.astype(w3_ref.dtype), w3_ref[...], preferred_element_type=jnp.float32)
    out_ref[...] = (q + b3_ref[...]).astype(out_ref.dtype)


def prepare_params(params, *, compute_dtype=None, pad_hidden_to=_LANE):
    """One-time parameter preparation (NOT in the per-call path).

    - Optionally zero-pads the hidden dim up to `pad_hidden_to` (e.g. 64 -> 128)
      so h1/h2 are full 128-lane vregs; padded columns stay exactly zero through
      bias-add/ReLU and the padded w3 rows are zero, so Q-values are unchanged.
    - Optionally casts the three weight matrices to `compute_dtype` (e.g. bf16 on
      v6e/v7x/v5e). Biases are always kept f32.
    """
    w1, b1 = params["w1"], params["b1"]
    w2, b2 = params["w2"], params["b2"]
    w3, b3 = params["w3"], params["b3"]
    H = w1.shape[1]

    b1 = b1.astype(jnp.float32)
    b2 = b2.astype(jnp.float32)
    b3 = b3.astype(jnp.float32)

    if pad_hidden_to is not None and H % pad_hidden_to != 0:
        Hp = _round_up(H, pad_hidden_to)
        pad = Hp - H
        w1 = jnp.pad(w1, ((0, 0), (0, pad)))
        b1 = jnp.pad(b1, ((0, 0), (0, pad)))
        w2 = jnp.pad(w2, ((0, pad), (0, pad)))
        b2 = jnp.pad(b2, ((0, 0), (0, pad)))
        w3 = jnp.pad(w3, ((0, pad), (0, 0)))

    if compute_dtype is not None:
        w1 = w1.astype(compute_dtype)
        w2 = w2.astype(compute_dtype)
        w3 = w3.astype(compute_dtype)

    return {"w1": w1, "b1": b1, "w2": w2, "b2": b2, "w3": w3, "b3": b3}


def qnetwork_forward(x, prepared, *, tile_b=None):
    """x: (B, input_dim); prepared: output of prepare_params (w's are (in, out))."""
    B, D_in = x.shape
    w1, b1 = prepared["w1"], prepared["b1"]
    w2, b2 = prepared["w2"], prepared["b2"]
    w3, b3 = prepared["w3"], prepared["b3"]
    H = w1.shape[1]
    A = w3.shape[1]
    out_dtype = x.dtype

    # Match the weights' compute dtype (no-op for f32 params).
    if x.dtype != w1.dtype:
        x = x.astype(w1.dtype)

    # Batch tiling: multiples of 8 (f32 sublane). Cap at 8192 rows so very large
    # batches amortize the ~0.35 us per-grid-step overhead while the
    # double-buffered x/out tiles stay ~1 MiB (well under every chip's scoped
    # VMEM). When B fits in one tile we still aim for >= 2 grid steps so v7x's
    # two TensorCores both get work.
    if tile_b is None:
        if B <= 2 * _SUBLANE:
            tile_b = B                                   # single full-extent block
        elif B <= _MAX_TILE_B:
            tile_b = _round_up(pl.cdiv(B, 2), _SUBLANE)  # >= 2 steps for v7x megacore
        else:
            tile_b = _MAX_TILE_B
    if tile_b >= B:
        tile_b = B
    else:
        tile_b = _round_up(tile_b, _SUBLANE)
    grid = (pl.cdiv(B, tile_b),)

    x_map = lambda i: (i, 0)
    p_map = lambda i: (0, 0)  # constant block index -> params DMA'd once, not per step

    out = pl.pallas_call(
        qnetwork_kernel,
        out_shape=jax.ShapeDtypeStruct((B, A), out_dtype),
        grid_spec=pltpu.PrefetchScalarGridSpec(
            num_scalar_prefetch=0,
            grid=grid,
            in_specs=[
                pl.BlockSpec((tile_b, D_in), x_map),
                pl.BlockSpec((D_in, H), p_map),
                pl.BlockSpec((1, H), p_map),
                pl.BlockSpec((H, H), p_map),
                pl.BlockSpec((1, H), p_map),
                pl.BlockSpec((H, A), p_map),
                pl.BlockSpec((1, A), p_map),
            ],
            out_specs=pl.BlockSpec((tile_b, A), x_map),
        ),
        compiler_params=pltpu.CompilerParams(
            dimension_semantics=("parallel",),
        ),
    )(x, w1, b1, w2, b2, w3, b3)

    return out


def init_qnetwork_params(key, input_dim, action_dim, hidden_dim=64, dtype=jnp.float32):
    """Deterministic init mimicking PyTorch nn.Linear (uniform +/- 1/sqrt(fan_in)).
    Weights are stored transposed to (in_features, out_features)."""
    keys = jax.random.split(key, 6)

    def linear(kw, kb, fan_in, fan_out):
        bound = 1.0 / jnp.sqrt(jnp.asarray(fan_in, dtype))
        w = jax.random.uniform(kw, (fan_in, fan_out), dtype, -bound, bound)
        b = jax.random.uniform(kb, (1, fan_out), dtype, -bound, bound)
        return w, b

    w1, b1 = linear(keys[0], keys[1], input_dim, hidden_dim)
    w2, b2 = linear(keys[2], keys[3], hidden_dim, hidden_dim)
    w3, b3 = linear(keys[4], keys[5], hidden_dim, action_dim)
    return {"w1": w1, "b1": b1, "w2": w2, "b2": b2, "w3": w3, "b3": b3}


def qnetwork_reference(x, params):
    h1 = jnp.maximum(x @ params["w1"] + params["b1"], 0.0)
    h2 = jnp.maximum(h1 @ params["w2"] + params["b2"], 0.0)
    return h2 @ params["w3"] + params["b3"]


if __name__ == "__main__":
    key = jax.random.PRNGKey(0)
    k_param, k_x_small, k_x_mid, k_x_big = jax.random.split(key, 4)

    input_dim, action_dim, hidden_dim = 16, 4, 64
    params = init_qnetwork_params(k_param, input_dim, action_dim, hidden_dim)

    # One-time prep (hidden dim padded 64 -> 128; f32 weights).
    prepared = prepare_params(params)

    # Small batch: single full-extent block.
    x_small = jax.random.normal(k_x_small, (8, input_dim), jnp.float32)
    out_small = jax.block_until_ready(qnetwork_forward(x_small, prepared))
    ref_small = qnetwork_reference(x_small, params)
    assert out_small.shape == (8, action_dim), out_small.shape
    assert jnp.allclose(out_small, ref_small, atol=1e-5, rtol=1e-5), "small-batch mismatch"

    # Mid batch with default tiling: auto-splits into >= 2 grid steps (v7x megacore).
    x_mid = jax.random.normal(k_x_mid, (1024, input_dim), jnp.float32)
    out_mid = jax.block_until_ready(qnetwork_forward(x_mid, prepared))
    ref_mid = qnetwork_reference(x_mid, params)
    assert out_mid.shape == (1024, action_dim), out_mid.shape
    assert jnp.allclose(out_mid, ref_mid, atol=1e-5, rtol=1e-5), "mid-batch mismatch"

    # Ragged batch (B not a multiple of tile_b): exercises Pallas ragged-last-block path.
    x_big = jax.random.normal(k_x_big, (1000, input_dim), jnp.float32)
    out_big = jax.block_until_ready(qnetwork_forward(x_big, prepared, tile_b=256))
    ref_big = qnetwork_reference(x_big, params)
    assert out_big.shape == (1000, action_dim), out_big.shape
    assert jnp.allclose(out_big, ref_big, atol=1e-5, rtol=1e-5), "ragged-batch mismatch"

    # Optional bf16 weight path (halves weight/x HBM reads; f32 accumulation & biases).
    prepared_bf16 = prepare_params(params, compute_dtype=jnp.bfloat16)
    out_bf16 = jax.block_until_ready(qnetwork_forward(x_mid, prepared_bf16))
    assert out_bf16.shape == (1024, action_dim), out_bf16.shape
    assert jnp.allclose(out_bf16.astype(jnp.float32), ref_mid, atol=0.15, rtol=0.15), \
        "bf16-path mismatch"

    print("KERNEL_OK")
</pallas_src>

<mosaic_0001>
module attributes {stable_mosaic.version = 11 : i64} {
  func.func @qnetwork_kernel(%arg0: i32, %arg1: memref<8x16xf32, #tpu.memory_space<vmem>>, %arg2: memref<16x128xf32, #tpu.memory_space<vmem>>, %arg3: memref<1x128xf32, #tpu.memory_space<vmem>>, %arg4: memref<128x128xf32, #tpu.memory_space<vmem>>, %arg5: memref<1x128xf32, #tpu.memory_space<vmem>>, %arg6: memref<128x4xf32, #tpu.memory_space<vmem>>, %arg7: memref<1x4xf32, #tpu.memory_space<vmem>>, %arg8: memref<8x4xf32, #tpu.memory_space<vmem>>) attributes {dimension_semantics = [#tpu.dimension_semantics<parallel>], iteration_bounds = array<i64: 1>, scalar_prefetch = 0 : i64, scratch_operands = 0 : i64, tpu.core_type = #tpu.core_type<tc>, window_params = [{transform_indices = @transform_0, window_bounds = array<i64: 8, 16>}, {pipeline_mode = #tpu.pipeline_mode<synchronous>, transform_indices = @transform_1, window_bounds = array<i64: 16, 128>}, {pipeline_mode = #tpu.pipeline_mode<synchronous>, transform_indices = @transform_2, window_bounds = array<i64: 1, 128>}, {pipeline_mode = #tpu.pipeline_mode<synchronous>, transform_indices = @transform_3, window_bounds = array<i64: 128, 128>}, {pipeline_mode = #tpu.pipeline_mode<synchronous>, transform_indices = @transform_4, window_bounds = array<i64: 1, 128>}, {pipeline_mode = #tpu.pipeline_mode<synchronous>, transform_indices = @transform_5, window_bounds = array<i64: 128, 4>}, {pipeline_mode = #tpu.pipeline_mode<synchronous>, transform_indices = @transform_6, window_bounds = array<i64: 1, 4>}, {transform_indices = @transform_7, window_bounds = array<i64: 8, 4>}]} {
    %c0 = arith.constant 0 : index
    %c0_0 = arith.constant 0 : index
    %0 = vector.load %arg1[%c0, %c0_0] : memref<8x16xf32, #tpu.memory_space<vmem>>, vector<8x16xf32>
    %c0_1 = arith.constant 0 : index
    %c0_2 = arith.constant 0 : index
    %1 = vector.load %arg2[%c0_1, %c0_2] : memref<16x128xf32, #tpu.memory_space<vmem>>, vector<16x128xf32>
    %cst = arith.constant dense<0.000000e+00> : vector<8x128xf32>
    %2 = tpu.matmul %0, %1, %cst {dimension_numbers = #tpu.dot_dimension_numbers<[1], [0], [0], [1], [0, 0, 1, 1], [], []>} : vector<8x16xf32>, vector<16x128xf32>, vector<8x128xf32> -> vector<8x128xf32>
    %c0_3 = arith.constant 0 : index
    %c0_4 = arith.constant 0 : index
    %3 = vector.load %arg3[%c0_3, %c0_4] : memref<1x128xf32, #tpu.memory_space<vmem>>, vector<1x128xf32>
    %4 = vector.broadcast %3 : vector<1x128xf32> to vector<8x128xf32>
    %5 = arith.addf %2, %4 : vector<8x128xf32>
    %cst_5 = arith.constant 0.000000e+00 : f32
    %6 = vector.broadcast %cst_5 : f32 to vector<8x128xf32>
    %7 = arith.maximumf %5, %6 : vector<8x128xf32>
    %c0_6 = arith.constant 0 : index
    %c0_7 = arith.constant 0 : index
    %8 = vector.load %arg4[%c0_6, %c0_7] : memref<128x128xf32, #tpu.memory_space<vmem>>, vector<128x128xf32>
    %cst_8 = arith.constant dense<0.000000e+00> : vector<8x128xf32>
    %9 = tpu.matmul %7, %8, %cst_8 {dimension_numbers = #tpu.dot_dimension_numbers<[1], [0], [0], [1], [0, 0, 1, 1], [], []>} : vector<8x128xf32>, vector<128x128xf32>, vector<8x128xf32> -> vector<8x128xf32>
    %c0_9 = arith.constant 0 : index
    %c0_10 = arith.constant 0 : index
    %10 = vector.load %arg5[%c0_9, %c0_10] : memref<1x128xf32, #tpu.memory_space<vmem>>, vector<1x128xf32>
    %11 = vector.broadcast %10 : vector<1x128xf32> to vector<8x128xf32>
    %12 = arith.addf %9, %11 : vector<8x128xf32>
    %cst_11 = arith.constant 0.000000e+00 : f32
    %13 = vector.broadcast %cst_11 : f32 to vector<8x128xf32>
    %14 = arith.maximumf %12, %13 : vector<8x128xf32>
    %c0_12 = arith.constant 0 : index
    %c0_13 = arith.constant 0 : index
    %15 = vector.load %arg6[%c0_12, %c0_13] : memref<128x4xf32, #tpu.memory_space<vmem>>, vector<128x4xf32>
    %cst_14 = arith.constant dense<0.000000e+00> : vector<8x4xf32>
    %16 = tpu.matmul %14, %15, %cst_14 {dimension_numbers = #tpu.dot_dimension_numbers<[1], [0], [0], [1], [0, 0, 1, 1], [], []>} : vector<8x128xf32>, vector<128x4xf32>, vector<8x4xf32> -> vector<8x4xf32>
    %c0_15 = arith.constant 0 : index
    %c0_16 = arith.constant 0 : index
    %17 = vector.load %arg7[%c0_15, %c0_16] : memref<1x4xf32, #tpu.memory_space<vmem>>, vector<1x4xf32>
    %18 = vector.broadcast %17 : vector<1x4xf32> to vector<8x4xf32>
    %19 = arith.addf %16, %18 : vector<8x4xf32>
    %c0_17 = arith.constant 0 : index
    %c0_18 = arith.constant 0 : index
    %20 = vector.load %arg8[%c0_17, %c0_18] : memref<8x4xf32, #tpu.memory_space<vmem>>, vector<8x4xf32>
    tpu.vector_store %arg8[%c0_17, %c0_18], %19 {strides = array<i32>} : memref<8x4xf32, #tpu.memory_space<vmem>>, vector<8x4xf32>,
    return
  }
  func.func @transform_0(%arg0: i32) -> (i32, i32) {
    %c0_i32 = arith.constant 0 : i32
    %c0_i32_0 = arith.constant 0 : i32
    return %arg0, %c0_i32 : i32, i32
  }
  func.func @transform_1(%arg0: i32) -> (i32, i32) {
    %c0_i32 = arith.constant 0 : i32
    %c0_i32_0 = arith.constant 0 : i32
    %c0_i32_1 = arith.constant 0 : i32
    return %c0_i32, %c0_i32_0 : i32, i32
  }
  func.func @transform_2(%arg0: i32) -> (i32, i32) {
    %c0_i32 = arith.constant 0 : i32
    %c0_i32_0 = arith.constant 0 : i32
    %c0_i32_1 = arith.constant 0 : i32
    return %c0_i32, %c0_i32_0 : i32, i32
  }
  func.func @transform_3(%arg0: i32) -> (i32, i32) {
    %c0_i32 = arith.constant 0 : i32
    %c0_i32_0 = arith.constant 0 : i32
    %c0_i32_1 = arith.constant 0 : i32
    return %c0_i32, %c0_i32_0 : i32, i32
  }
  func.func @transform_4(%arg0: i32) -> (i32, i32) {
    %c0_i32 = arith.constant 0 : i32
    %c0_i32_0 = arith.constant 0 : i32
    %c0_i32_1 = arith.constant 0 : i32
    return %c0_i32, %c0_i32_0 : i32, i32
  }
  func.func @transform_5(%arg0: i32) -> (i32, i32) {
    %c0_i32 = arith.constant 0 : i32
    %c0_i32_0 = arith.constant 0 : i32
    %c0_i32_1 = arith.constant 0 : i32
    return %c0_i32, %c0_i32_0 : i32, i32
  }
  func.func @transform_6(%arg0: i32) -> (i32, i32) {
    %c0_i32 = arith.constant 0 : i32
    %c0_i32_0 = arith.constant 0 : i32
    %c0_i32_1 = arith.constant 0 : i32
    return %c0_i32, %c0_i32_0 : i32, i32
  }
  func.func @transform_7(%arg0: i32) -> (i32, i32) {
    %c0_i32 = arith.constant 0 : i32
    %c0_i32_0 = arith.constant 0 : i32
    return %arg0, %c0_i32 : i32, i32
  }
}

</mosaic_0001>

<bundles_post_ra>
// kernel: tpu_custom_call.1
= control target key start
LH: loop header
LB: loop body
LE: loop exit
PB: predicated region body
PF: predicated region fallthrough
CT: control target
= control target key end

     0   :  { %12 = vsyncpa [#allocation3], 0  ;;  %s700_s0 = inlined_call_operand.vmem [shape: f32[8,16], index: 0, kind: input, shape index: {}]   ;;  %s701_s1 = inlined_call_operand.hbm [shape: f32[16,128], index: 1, kind: input, shape index: {}]   ;;  %s702_s2 = inlined_call_operand.vmem [shape: f32[1,128], index: 2, kind: input, shape index: {}]   ;;  %s703_s3 = inlined_call_operand.vmem [shape: f32[128,128], index: 3, kind: input, shape index: {}]   ;;  %s704_s4 = inlined_call_operand.hbm [shape: f32[1,128], index: 4, kind: input, shape index: {}]   ;;  %s705_s5 = inlined_call_operand.vmem [shape: f32[128,4], index: 5, kind: input, shape index: {}]   ;;  %s706_s6 = inlined_call_operand.vmem [shape: f32[1,4], index: 6, kind: input, shape index: {}]   ;;  %s707_s7 = inlined_call_operand.vmem [shape: f32[8,4], index: 7, kind: output, shape index: {}]  }
   0x1   :  { %13 = vsyncpa [#allocation5], 0  ;;  %s500_s24 = smov [#allocation2]  }
   0x2   :  { %s21_s25 = sshll.u32 %s500_s24, 4  ;;  %s22_s25 = int_to_ptr.vmem [resolvable:$true] %s21_s25 }
   0x3   :  { %s464_s26 = scalar_lea.vmem %s22_s25, 256  ;;  %p469_p1 = scmp.lt.s32.totalorder %s22_s25, %s22_s25 }
   0x4   :  { %p465_p0 = scmp.ne.s32.totalorder %s22_s25, %s464_s26  ;;  %p470_p2 = scmp.lt.s32.totalorder %s464_s26, %s464_s26 }
   0x6   :  { %p471_p3 = por %p470_p2, %p469_p1 }
   0x8   :  { %p472_p4 = pnand %p471_p3, %p465_p0 }
   0xa   :  { %475 = shalt.err (!%p472_p4)
}
   0xb   :  { %s501_s27 = smov 128   ;;  %s502_s28 = smov 8  }
   0xc   :  { %27 = dma.hbm_to_vmem [thread:$0]  %s701_s1, 256, %s22_s25, [#allocation3], %s501_s27, %s501_s27, %s502_s28  }
   0xd   :  { %s503_s8 = smov [#allocation4]  }
   0xe   :  { %s38_s9 = sshll.u32 %s503_s8, 4  ;;  %s39_s9 = int_to_ptr.vmem [resolvable:$true] %s38_s9 }
   0xf   :  { %s484_s10 = scalar_lea.vmem %s39_s9, 16  ;;  %s488_s11 = scalar_lea.vmem %s39_s9, 32 }
  0x10   :  { %p485_p5 = scmp.ne.s32.totalorder %s39_s9, %s484_s10  ;;  %p489_p6 = scmp.lt.s32.totalorder %s39_s9, %s39_s9 }
  0x11   :  { %p490_p7 = scmp.lt.s32.totalorder %s488_s11, %s484_s10 }
  0x13   :  { %p491_p8 = por %p490_p7, %p489_p6 }
  0x15   :  { %p492_p9 = pnand %p491_p8, %p485_p5 }
  0x17   :  { %495 = shalt.err (!%p492_p9)
}
  0x18   :  { %41 = dma.hbm_to_vmem [thread:$0]  %s704_s4, 16, %s39_s9, [#allocation5]  }
  0x19   :  { %496 = dma.done.wait [#allocation3], 256  }
  0x1a   :  { %497 = vsyncadd [#allocation3], 4294967040 }
  0x1b   :  { %498 = dma.done.wait [#allocation5], 16  }
  0x1c   :  { %499 = vsyncadd [#allocation5], 4294967280  ;;  %v504_v0 = vmov 0.0   ;;  %vm505_vm0 = vmmov 0   ;;  %v54_v1 = vld [vmem:[#allocation2 + $0x8] sm:$0xff]  ;;  %v53_v2 = vld [vmem:[#allocation2] sm:$0xff] }
  0x1d   :  { %373 = vmatprep.subr.mxu0 %v504_v0  ;;  %377 = vmatprep.mubr.msk.f32.mxu0 %vm505_vm0, %v504_v0  ;;  %v52_v3 = vld [vmem:[%s700_s0] sm:$0xff]  ;;  %vm62_vm1 = vcmask 130048   ;;  %v152_v4 = vld [vmem:[%s703_s3 + $0x78] sm:$0xff]  ;;  %v151_v5 = vld [vmem:[%s703_s3 + $0x70] sm:$0xff]  ;;  %vm324_vm2 = vcmask 31744  }
  0x1e   :  { %380 = vmatprep.subr.mxu1 %v504_v0  ;;  %412 = vmatprep.mubr.msk.f32.mxu1 %vm505_vm0, %v504_v0  ;;  %v150_v6 = vld [vmem:[%s703_s3 + $0x68] sm:$0xff]  ;;  %v149_v7 = vld [vmem:[%s703_s3 + $0x60] sm:$0xff]  ;;  %v148_v8 = vld [vmem:[%s703_s3 + $0x58] sm:$0xff] }
  0x1f   :  { %374 = vmatpush3.msra.mxu0 %v54_v1  ;;  %381 = vmatpush3.msra.mxu1 %v152_v4  ;;  %v147_v9 = vld [vmem:[%s703_s3 + $0x50] sm:$0xff]  ;;  %v146_v10 = vld [vmem:[%s703_s3 + $0x48] sm:$0xff]  ;;  %v145_v11 = vld [vmem:[%s703_s3 + $0x40] sm:$0xff] }
  0x20   :  { %375 = vmatprep.subr.mxu0 %v504_v0  ;;  %382 = vmatprep.subr.mxu1 %v504_v0  ;;  %v144_v12 = vld [vmem:[%s703_s3 + $0x38] sm:$0xff]  ;;  %v143_v13 = vld [vmem:[%s703_s3 + $0x30] sm:$0xff]  ;;  %v142_v14 = vld [vmem:[%s703_s3 + $0x28] sm:$0xff] }
  0x21   :  { %376 = vmatpush3.msra.mxu0 %v53_v2  ;;  %383 = vmatpush3.msra.mxu1 %v151_v5  ;;  %v141_v15 = vld [vmem:[%s703_s3 + $0x20] sm:$0xff]  ;;  %v140_v16 = vld [vmem:[%s703_s3 + $0x18] sm:$0xff]  ;;  %v139_v17 = vld [vmem:[%s703_s3 + $0x10] sm:$0xff] }
  0x22   :  { %378 = vmatmul.mubr.msk.f32.vlgmr.msra.gmra.mxu0 %vm62_vm1, %v52_v3  ;;  %384 = vmatprep.subr.mxu1 %v504_v0  ;;  %v138_v18 = vld [vmem:[%s703_s3 + $0x8] sm:$0xff]  ;;  %v137_v19 = vld [vmem:[%s703_s3] sm:$0xff]  ;;  %v246_v20 = vld [vmem:[%s705_s5 + $0x78] sm:$0xff] }
  0x23   :  { %415 = vmatprep.subr.mxu0 %v504_v0  ;;  %385 = vmatpush3.msra.mxu1 %v150_v6  ;;  %v245_v21 = vld [vmem:[%s705_s5 + $0x70] sm:$0xff]  ;;  %v244_v22 = vld [vmem:[%s705_s5 + $0x68] sm:$0xff]  ;;  %v243_v23 = vld [vmem:[%s705_s5 + $0x60] sm:$0xff] }
  0x24   :  { %447 = vmatprep.mubr.msk.f32.mxu0 %vm505_vm0, %v504_v0  ;;  %386 = vmatprep.subr.mxu1 %v504_v0  ;;  %v242_v24 = vld [vmem:[%s705_s5 + $0x58] sm:$0xff]  ;;  %v241_v25 = vld [vmem:[%s705_s5 + $0x50] sm:$0xff]  ;;  %v240_v26 = vld [vmem:[%s705_s5 + $0x48] sm:$0xff] }
  0x25   :  { %387 = vmatpush3.msra.mxu1 %v149_v7  ;;  %416 = vmatpush3.msra.mxu0 %v246_v20  ;;  %v239_v27 = vld [vmem:[%s705_s5 + $0x40] sm:$0xff]  ;;  %v238_v28 = vld [vmem:[%s705_s5 + $0x38] sm:$0xff]  ;;  %v237_v29 = vld [vmem:[%s705_s5 + $0x30] sm:$0xff] }
  0x26   :  { %388 = vmatprep.subr.mxu1 %v504_v0  ;;  %417 = vmatprep.subr.mxu0 %v504_v0  ;;  %v236_v30 = vld [vmem:[%s705_s5 + $0x28] sm:$0xff]  ;;  %v235_v31 = vld [vmem:[%s705_s5 + $0x20] sm:$0xff]  ;;  %v234_v32 = vld [vmem:[%s705_s5 + $0x18] sm:$0xff] }
  0x27   :  { %389 = vmatpush3.msra.mxu1 %v148_v8  ;;  %418 = vmatpush3.msra.mxu0 %v245_v21  ;;  %v332_v33 = vld [vmem:[%s702_s2] ss:$0 sm:$0xff]  ;;  %v233_v38 = vld [vmem:[%s705_s5 + $0x10] sm:$0xff]  ;;  %v232_v39 = vld [vmem:[%s705_s5 + $0x8] sm:$0xff] }
  0x28   :  { %390 = vmatprep.subr.mxu1 %v504_v0  ;;  %419 = vmatprep.subr.mxu0 %v504_v0  ;;  %v231_v40 = vld [vmem:[%s705_s5] sm:$0xff]  ;;  %v334_v41 = vld [vmem:[#allocation4] ss:$0 sm:$0xff] }
  0x29   :  { %391 = vmatpush3.msra.mxu1 %v147_v9  ;;  %420 = vmatpush3.msra.mxu0 %v244_v22  ;;  %v335_v46 = vld [vmem:[%s706_s6] ss:$0 sm:$0xff] }
  0x2a   :  { %392 = vmatprep.subr.mxu1 %v504_v0  ;;  %421 = vmatprep.subr.mxu0 %v504_v0 }
  0x2b   :  { %393 = vmatpush3.msra.mxu1 %v146_v10  ;;  %422 = vmatpush3.msra.mxu0 %v243_v23 }
  0x2c   :  { %394 = vmatprep.subr.mxu1 %v504_v0  ;;  %423 = vmatprep.subr.mxu0 %v504_v0 }
  0x2d   :  { %395 = vmatpush3.msra.mxu1 %v145_v11  ;;  %424 = vmatpush3.msra.mxu0 %v242_v24 }
  0x2e   :  { %396 = vmatprep.subr.mxu1 %v504_v0  ;;  %425 = vmatprep.subr.mxu0 %v504_v0 }
  0x2f   :  { %397 = vmatpush3.msra.mxu1 %v144_v12  ;;  %426 = vmatpush3.msra.mxu0 %v241_v25 }
  0x30   :  { %398 = vmatprep.subr.mxu1 %v504_v0  ;;  %427 = vmatprep.subr.mxu0 %v504_v0 }
  0x31   :  { %399 = vmatpush3.msra.mxu1 %v143_v13  ;;  %428 = vmatpush3.msra.mxu0 %v240_v26 }
  0x32   :  { %400 = vmatprep.subr.mxu1 %v504_v0  ;;  %429 = vmatprep.subr.mxu0 %v504_v0 }
  0x33   :  { %401 = vmatpush3.msra.mxu1 %v142_v14  ;;  %430 = vmatpush3.msra.mxu0 %v239_v27 }
  0x34   :  { %402 = vmatprep.subr.mxu1 %v504_v0  ;;  %431 = vmatprep.subr.mxu0 %v504_v0 }
  0x35   :  { %403 = vmatpush3.msra.mxu1 %v141_v15  ;;  %432 = vmatpush3.msra.mxu0 %v238_v28 }
  0x36   :  { %404 = vmatprep.subr.mxu1 %v504_v0  ;;  %433 = vmatprep.subr.mxu0 %v504_v0 }
  0x37   :  { %405 = vmatpush3.msra.mxu1 %v140_v16  ;;  %434 = vmatpush3.msra.mxu0 %v237_v29 }
  0x38   :  { %406 = vmatprep.subr.mxu1 %v504_v0  ;;  %435 = vmatprep.subr.mxu0 %v504_v0 }
  0x39   :  { %407 = vmatpush3.msra.mxu1 %v139_v17  ;;  %436 = vmatpush3.msra.mxu0 %v236_v30 }
  0x3a   :  { %408 = vmatprep.subr.mxu1 %v504_v0  ;;  %437 = vmatprep.subr.mxu0 %v504_v0 }
  0x3b   :  { %409 = vmatpush3.msra.mxu1 %v138_v18  ;;  %438 = vmatpush3.msra.mxu0 %v235_v31 }
  0x3c   :  { %410 = vmatprep.subr.mxu1 %v504_v0  ;;  %439 = vmatprep.subr.mxu0 %v504_v0 }
  0x3d   :  { %411 = vmatpush3.msra.mxu1 %v137_v19  ;;  %440 = vmatpush3.msra.mxu0 %v234_v32 }
  0x3e   :  { %441 = vmatprep.subr.mxu0 %v504_v0 }
  0x3f   :  { %442 = vmatpush3.msra.mxu0 %v233_v38 }
  0x40   :  { %443 = vmatprep.subr.mxu0 %v504_v0 }
  0x41   :  { %444 = vmatpush3.msra.mxu0 %v232_v39 }
  0x42   :  { %445 = vmatprep.subr.mxu0 %v504_v0 }
  0x43   :  { %446 = vmatpush3.msra.mxu0 %v231_v40 }
  0xe2   :  { %v132_v34 = vpop.f32.mrf.mxu0 }
  0xe3   :  { %v133_v35 = vadd.f32 %v332_v33, %v132_v34 }
  0xe4   :  { %v379_v36 = vpop.f32.mrf.mxu0 }
  0xe5   :  { %v136_v37 = vmax.f32 %v133_v35, 0.0 }
  0xe7   :  { %413 = vmatmul.mubr.f32.vlgmr.msra.gmra.mxu1 %v136_v37 }
 0x1a7   :  { %v226_v42 = vpop.f32.mrf.mxu1 }
 0x1a8   :  { %v227_v43 = vadd.f32 %v334_v41, %v226_v42 }
 0x1a9   :  { %v414_v44 = vpop.f32.mrf.mxu1 }
 0x1aa   :  { %v230_v45 = vmax.f32 %v227_v43, 0.0 }
 0x1ac   :  { %448 = vmatmul.mubr.f32.vlgmr.msra.gmra.mxu0 %v230_v45 }
 0x26c   :  { %v320_v47 = vpop.f32.mrf.mxu0 }
 0x26d   :  { %v321_v48 = vadd.f32 %v335_v46, %v320_v47 }
 0x26e   :  { %v449_v49 = vpop.f32.mrf.mxu0 }
 0x26f   :  { %325 = vst.msk [vmem:[%s707_s7] sm:$0xff] %vm324_vm2, %v321_v48 }
 0x270   :  { %330 = vsyncpa [#allocation3], 1 }
 0x271   :  { %331 = vsyncpa [#allocation5], 1 }

</bundles_post_ra>
